<compile_context>
chip_gen: v6e
topology: v6e:2x2x1
jax: 0.10.0
libtpu: 0.0.40
codegen_flags: <defaults>
</compile_context>

<pallas_src>
import functools
import math

import jax
import jax.numpy as jnp
from jax.experimental import pallas as pl
from jax.experimental.pallas import tpu as pltpu

_LANES = 128


def _se_kernel(x_ref, w1_ref, w2_ref, b_ref, o_ref):
    # x_ref : (TM, L)   packed input rows, L = F*C lanes
    # w1_ref: (L, F*Cr) block-diagonal kron(I_F, W1)
    # w2_ref: (F*Cr, L) block-diagonal kron(I_F, W2)
    # b_ref : (2, L)    row 0 = tiled b1 (zero-padded to L), row 1 = tiled b2
    # o_ref : (TM, L)
    fcr = w1_ref.shape[1]
    x = x_ref[...]                      # native dtype straight into the MXU

    # fc1 + ReLU (f32 accumulation on the MXU)
    h = jnp.dot(x, w1_ref[...], preferred_element_type=jnp.float32)
    h = jnp.maximum(h + b_ref[0:1, :fcr].astype(jnp.float32), 0.0)

    # fc2 + sigmoid (gate math in f32 on all generations)
    s = jnp.dot(h.astype(w2_ref.dtype), w2_ref[...],
                preferred_element_type=jnp.float32)
    s = jax.nn.sigmoid(s + b_ref[1:2, :].astype(jnp.float32))

    # elementwise gating at full 128-lane width, unmasked stores
    o_ref[...] = (x.astype(jnp.float32) * s).astype(o_ref.dtype)


@functools.partial(jax.jit, static_argnames=("tile_rows",))
def channel_se_layer_sa(x, w1, b1, w2, b2, *, tile_rows=2048):
    """x: (..., C).  w1: (C, Cr), b1: (Cr,), w2: (Cr, C), b2: (C,).

    Weights are stored pre-transposed as (in_features, out_features).
    """
    orig_shape = x.shape
    C = orig_shape[-1]
    Cr = w1.shape[1]
    M = math.prod(orig_shape[:-1])
    x2 = x.reshape(M, C)

    # ---- lane-dense packing: fold F rows into the 128-lane axis -------------
    F = max(1, _LANES // C)
    L = F * C
    FCr = F * Cr

    n_rows = pl.cdiv(M, F)                          # packed rows
    # Large tiles, but keep >= 2 grid steps so megacore (v7x) can split M.
    tr = min(tile_rows, pl.cdiv(n_rows, 2))
    tr = max(8, pl.cdiv(tr, 8) * 8)                 # sublane multiple of 8
    n_rows_pad = pl.cdiv(n_rows, tr) * tr
    M_pad = n_rows_pad * F

    if M_pad != M:                                  # pad instead of asserting
        x2 = jnp.pad(x2, ((0, M_pad - M), (0, 0)))
    xp = x2.reshape(n_rows_pad, L)

    # ---- block-diagonal weights + merged biases (built once, a few KiB) -----
    w1_blk = jnp.kron(jnp.eye(F, dtype=w1.dtype), w1)      # (L, F*Cr)
    w2_blk = jnp.kron(jnp.eye(F, dtype=w2.dtype), w2)      # (F*Cr, L)
    b1_row = jnp.pad(jnp.tile(b1.astype(jnp.float32), F), (0, L - FCr))
    b2_row = jnp.tile(b2.astype(jnp.float32), F)
    b_merged = jnp.stack([b1_row, b2_row])                  # (2, L)

    grid = (n_rows_pad // tr,)

    # ---- VMEM budget: double-buffered x/out tiles + resident weights --------
    itemsize = x.dtype.itemsize
    tile_bytes = tr * L * itemsize
    w_bytes = (L * FCr + FCr * L) * w1_blk.dtype.itemsize + 2 * L * 4
    needed = 2 * (tile_bytes + tile_bytes) + 2 * w_bytes
    vmem_limit = int(max(32 * 2**20, needed + 8 * 2**20))

    out_p = pl.pallas_call(
        _se_kernel,
        out_shape=jax.ShapeDtypeStruct((n_rows_pad, L), x.dtype),
        grid_spec=pltpu.PrefetchScalarGridSpec(
            num_scalar_prefetch=0,
            grid=grid,
            in_specs=[
                pl.BlockSpec((tr, L), lambda i: (i, 0)),     # packed x tile
                pl.BlockSpec((L, FCr), lambda i: (0, 0)),    # block-diag W1
                pl.BlockSpec((FCr, L), lambda i: (0, 0)),    # block-diag W2
                pl.BlockSpec((2, L), lambda i: (0, 0)),      # merged biases
            ],
            out_specs=pl.BlockSpec((tr, L), lambda i: (i, 0)),
        ),
        compiler_params=pltpu.CompilerParams(
            dimension_semantics=("parallel",),
            vmem_limit_bytes=vmem_limit,
        ),
        # input_output_aliases={0: 0} intentionally omitted: xp may share a
        # buffer with the caller's (non-donated) input, so XLA would insert a
        # defensive copy and negate the minor allocation win.
    )(xp, w1_blk, w2_blk, b_merged)

    out = out_p.reshape(M_pad, C)[:M]
    return out.reshape(orig_shape)


def _reference(x, w1, b1, w2, b2):
    # Pure-JAX reference matching the PyTorch forward exactly.
    xf = x.astype(jnp.float32)
    h = jax.nn.relu(xf @ w1 + b1)
    s = jax.nn.sigmoid(h @ w2 + b2)
    return (xf * s).astype(x.dtype)


if __name__ == "__main__":
    # Module config (synthetic, deterministic init — no checkpoint load).
    num_channels = 16
    reduction_ratio = 2
    num_channels_reduced = num_channels // reduction_ratio  # 8

    # Docstring says (B, C, H, W); nn.Linear acts on the last dim, so the last
    # dim must equal num_channels for the module to run.
    B, Cdim, H, W = 2, 4, 16, num_channels

    key = jax.random.PRNGKey(0)
    kx, k1, k2, k3, k4 = jax.random.split(key, 5)

    x = jax.random.normal(kx, (B, Cdim, H, W), dtype=jnp.float32)

    # PyTorch-style Linear init bounds (uniform +/- 1/sqrt(fan_in)).
    bound1 = 1.0 / (num_channels ** 0.5)
    bound2 = 1.0 / (num_channels_reduced ** 0.5)
    # Stored pre-transposed as (in_features, out_features).
    w1 = jax.random.uniform(k1, (num_channels, num_channels_reduced),
                            minval=-bound1, maxval=bound1, dtype=jnp.float32)
    b1 = jax.random.uniform(k2, (num_channels_reduced,),
                            minval=-bound1, maxval=bound1, dtype=jnp.float32)
    w2 = jax.random.uniform(k3, (num_channels_reduced, num_channels),
                            minval=-bound2, maxval=bound2, dtype=jnp.float32)
    b2 = jax.random.uniform(k4, (num_channels,),
                            minval=-bound2, maxval=bound2, dtype=jnp.float32)

    out = channel_se_layer_sa(x, w1, b1, w2, b2)
    out = jax.block_until_ready(out)

    ref = _reference(x, w1, b1, w2, b2)
    assert out.shape == x.shape and out.dtype == x.dtype
    assert jnp.allclose(out, ref, atol=2e-5, rtol=2e-5), "mismatch vs reference"

    print("KERNEL_OK")
</pallas_src>

<mosaic_0001>
module attributes {stable_mosaic.version = 11 : i64} {
  func.func @_se_kernel(%arg0: i32, %arg1: memref<8x128xf32, #tpu.memory_space<vmem>>, %arg2: memref<128x64xf32, #tpu.memory_space<vmem>>, %arg3: memref<64x128xf32, #tpu.memory_space<vmem>>, %arg4: memref<2x128xf32, #tpu.memory_space<vmem>>, %arg5: memref<8x128xf32, #tpu.memory_space<vmem>>) attributes {dimension_semantics = [#tpu.dimension_semantics<parallel>], iteration_bounds = array<i64: 2>, scalar_prefetch = 0 : i64, scratch_operands = 0 : i64, tpu.core_type = #tpu.core_type<tc>, window_params = [{transform_indices = @transform_0, window_bounds = array<i64: 8, 128>}, {pipeline_mode = #tpu.pipeline_mode<synchronous>, transform_indices = @transform_1, window_bounds = array<i64: 128, 64>}, {pipeline_mode = #tpu.pipeline_mode<synchronous>, transform_indices = @transform_2, window_bounds = array<i64: 64, 128>}, {pipeline_mode = #tpu.pipeline_mode<synchronous>, transform_indices = @transform_3, window_bounds = array<i64: 2, 128>}, {transform_indices = @transform_4, window_bounds = array<i64: 8, 128>}]} {
    %c0 = arith.constant 0 : index
    %c0_0 = arith.constant 0 : index
    %0 = vector.load %arg1[%c0, %c0_0] : memref<8x128xf32, #tpu.memory_space<vmem>>, vector<8x128xf32>
    %c0_1 = arith.constant 0 : index
    %c0_2 = arith.constant 0 : index
    %1 = vector.load %arg2[%c0_1, %c0_2] : memref<128x64xf32, #tpu.memory_space<vmem>>, vector<128x64xf32>
    %cst = arith.constant dense<0.000000e+00> : vector<8x64xf32>
    %2 = tpu.matmul %0, %1, %cst {dimension_numbers = #tpu.dot_dimension_numbers<[1], [0], [0], [1], [0, 0, 1, 1], [], []>} : vector<8x128xf32>, vector<128x64xf32>, vector<8x64xf32> -> vector<8x64xf32>
    %c0_3 = arith.constant 0 : index
    %c0_4 = arith.constant 0 : index
    %3 = vector.load %arg4[%c0_3, %c0_4] : memref<2x128xf32, #tpu.memory_space<vmem>>, vector<1x64xf32>
    %4 = vector.broadcast %3 : vector<1x64xf32> to vector<8x64xf32>
    %5 = arith.addf %2, %4 : vector<8x64xf32>
    %cst_5 = arith.constant 0.000000e+00 : f32
    %6 = vector.broadcast %cst_5 : f32 to vector<8x64xf32>
    %7 = arith.maximumf %5, %6 : vector<8x64xf32>
    %c0_6 = arith.constant 0 : index
    %c0_7 = arith.constant 0 : index
    %8 = vector.load %arg3[%c0_6, %c0_7] : memref<64x128xf32, #tpu.memory_space<vmem>>, vector<64x128xf32>
    %cst_8 = arith.constant dense<0.000000e+00> : vector<8x128xf32>
    %9 = tpu.matmul %7, %8, %cst_8 {dimension_numbers = #tpu.dot_dimension_numbers<[1], [0], [0], [1], [0, 0, 1, 1], [], []>} : vector<8x64xf32>, vector<64x128xf32>, vector<8x128xf32> -> vector<8x128xf32>
    %c1 = arith.constant 1 : index
    %c0_9 = arith.constant 0 : index
    %10 = vector.load %arg4[%c1, %c0_9] : memref<2x128xf32, #tpu.memory_space<vmem>>, vector<1x128xf32>
    %11 = vector.broadcast %10 : vector<1x128xf32> to vector<8x128xf32>
    %12 = arith.addf %9, %11 : vector<8x128xf32>
    %13 = arith.negf %12 : vector<8x128xf32>
    %14 = math.exp %13 : vector<8x128xf32>
    %cst_10 = arith.constant 1.000000e+00 : f32
    %15 = vector.broadcast %cst_10 : f32 to vector<8x128xf32>
    %16 = arith.addf %15, %14 : vector<8x128xf32>
    %17 = arith.divf %15, %16 : vector<8x128xf32>
    %18 = arith.mulf %0, %17 : vector<8x128xf32>
    %c0_11 = arith.constant 0 : index
    %c0_12 = arith.constant 0 : index
    %19 = vector.load %arg5[%c0_11, %c0_12] : memref<8x128xf32, #tpu.memory_space<vmem>>, vector<8x128xf32>
    tpu.vector_store %arg5[%c0_11, %c0_12], %18 {strides = array<i32>} : memref<8x128xf32, #tpu.memory_space<vmem>>, vector<8x128xf32>,
    return
  }
  func.func @transform_0(%arg0: i32) -> (i32, i32) {
    %c0_i32 = arith.constant 0 : i32
    %c0_i32_0 = arith.constant 0 : i32
    return %arg0, %c0_i32 : i32, i32
  }
  func.func @transform_1(%arg0: i32) -> (i32, i32) {
    %c0_i32 = arith.constant 0 : i32
    %c0_i32_0 = arith.constant 0 : i32
    %c0_i32_1 = arith.constant 0 : i32
    return %c0_i32, %c0_i32_0 : i32, i32
  }
  func.func @transform_2(%arg0: i32) -> (i32, i32) {
    %c0_i32 = arith.constant 0 : i32
    %c0_i32_0 = arith.constant 0 : i32
    %c0_i32_1 = arith.constant 0 : i32
    return %c0_i32, %c0_i32_0 : i32, i32
  }
  func.func @transform_3(%arg0: i32) -> (i32, i32) {
    %c0_i32 = arith.constant 0 : i32
    %c0_i32_0 = arith.constant 0 : i32
    %c0_i32_1 = arith.constant 0 : i32
    return %c0_i32, %c0_i32_0 : i32, i32
  }
  func.func @transform_4(%arg0: i32) -> (i32, i32) {
    %c0_i32 = arith.constant 0 : i32
    %c0_i32_0 = arith.constant 0 : i32
    return %arg0, %c0_i32 : i32, i32
  }
}

</mosaic_0001>

<bundles_post_ra>
// kernel: tile.13
= control target key start
LH: loop header
LB: loop body
LE: loop exit
PB: predicated region body
PF: predicated region fallthrough
CT: control target
= control target key end

     0   :  { %s22_s0 = inlined_call_operand.vmem [shape: f32[8], index: 0, kind: input, shape index: {}]   ;;  %s23_s1 = inlined_call_operand.vmem [shape: f32[8,8], index: 1, kind: output, shape index: {}]  }
   0x1   :  { %v4_v0 = vld [vmem:[%s22_s0] ss:$0 sm:$0xff] }
   0x2   :  { %5 = vst [vmem:[%s23_s1] sm:$0xff] %v4_v0 }

// kernel: tile.14
= control target key start
LH: loop header
LB: loop body
LE: loop exit
PB: predicated region body
PF: predicated region fallthrough
CT: control target
= control target key end

     0   :  { %s69_s10 = smov 56   ;;  %s70_s11 = smov 40   ;;  %vm3_vm0 = vcmask 64512   ;;  %vm9_vm1 = vcmask 523712   ;;  %vm15_vm2 = vcmask 458112   ;;  %vm21_vm3 = vcmask 392512   ;;  %s113_s0 = inlined_call_operand.vmem [shape: f32[8,8], index: 0, kind: input, shape index: {}]   ;;  %s114_s1 = inlined_call_operand.vmem [shape: f32[64], index: 1, kind: output, shape index: {}]  }
   0x1   :  { %v55_v0 = vld [vmem:[%s113_s0 + $0x7] sm:$0x1]   ;;  %v57_v1 = vld [vmem:[%s113_s0 + $0x5] sm:$0x1]   ;;  %v56_v2 = vld [vmem:[%s113_s0 + $0x6] sm:$0x1]  }
   0x2   :  { %7 = vrot.lane.b32.xlu0 %v55_v0, %s69_s10  ;;  %19 = vrot.lane.b32.xlu1 %v57_v1, %s70_s11  ;;  %v58_v3 = vld [vmem:[%s113_s0 + $0x4] sm:$0x1]   ;;  %v2_v4 = vld [vmem:[%s113_s0] sm:$0x1]   ;;  %s71_s18 = smov 48   ;;  %s72_s19 = smov 32  }
   0x3   :  { %4 = vst.msk [vmem:[#allocation0] sm:$0x1] %vm3_vm0, %v2_v4   ;;  %v59_v5 = vld [vmem:[%s113_s0 + $0x3] sm:$0x1]   ;;  %v60_v6 = vld [vmem:[%s113_s0 + $0x2] sm:$0x1]  }
   0x4   :  { %s73_s24 = smov 24   ;;  %s74_s25 = smov 16   ;;  %v61_v7 = vld [vmem:[%s113_s0 + $0x1] sm:$0x1]   ;;  %vm27_vm4 = vcmask 326912   ;;  %vm33_vm5 = vcmask 261312  }
   0x5   :  { %s75_s0 = smov 8   ;;  %vm39_vm6 = vcmask 195712   ;;  %vm45_vm7 = vcmask 130112  }
   0x6   :  { %13 = vrot.lane.b32.xlu0 %v56_v2, %s71_s18  ;;  %25 = vrot.lane.b32.xlu1 %v58_v3, %s72_s19 }
   0xa   :  { %31 = vrot.lane.b32.xlu0 %v59_v5, %s73_s24  ;;  %37 = vrot.lane.b32.xlu1 %v60_v6, %s74_s25 }
   0xe   :  { %43 = vrot.lane.b32.xlu0 %v61_v7, %s75_s0 }
  0x74   :  { %v8_v8 = vpop.permute.xlu0 %7   ;;  %v20_v9 = vpop.permute.xlu1 %19  }
  0x75   :  { %10 = vst.msk [vmem:[#allocation0] sm:$0x1] %vm9_vm1, %v8_v8  }
  0x78   :  { %v14_v10 = vpop.permute.xlu0 %13   ;;  %v26_v11 = vpop.permute.xlu1 %25  }
  0x79   :  { %16 = vst.msk [vmem:[#allocation0] sm:$0x1] %vm15_vm2, %v14_v10  }
  0x7a   :  { %22 = vst.msk [vmem:[#allocation0] sm:$0x1] %vm21_vm3, %v20_v9  }
  0x7b   :  { %28 = vst.msk [vmem:[#allocation0] sm:$0x1] %vm27_vm4, %v26_v11  }
  0x7c   :  { %v32_v12 = vpop.permute.xlu0 %31   ;;  %v38_v13 = vpop.permute.xlu1 %37  }
  0x7d   :  { %34 = vst.msk [vmem:[#allocation0] sm:$0x1] %vm33_vm5, %v32_v12  }
  0x7e   :  { %40 = vst.msk [vmem:[#allocation0] sm:$0x1] %vm39_vm6, %v38_v13  }
  0x80   :  { %v44_v14 = vpop.permute.xlu0 %43  }
  0x81   :  { %46 = vst.msk [vmem:[#allocation0] sm:$0x1] %vm45_vm7, %v44_v14  }
  0x88   :  { %v51_v15 = vld [vmem:[#allocation0] sm:$0x1] }
  0x89   :  { %54 = vst [vmem:[%s114_s1] sm:$0x1] %v51_v15 }

// kernel: tile.18
= control target key start
LH: loop header
LB: loop body
LE: loop exit
PB: predicated region body
PF: predicated region fallthrough
CT: control target
= control target key end

     0   :  { %s22_s0 = inlined_call_operand.vmem [shape: f32[16], index: 0, kind: input, shape index: {}]   ;;  %s23_s1 = inlined_call_operand.vmem [shape: f32[8,16], index: 1, kind: output, shape index: {}]  }
   0x1   :  { %v4_v0 = vld [vmem:[%s22_s0] ss:$0 sm:$0xff] }
   0x2   :  { %5 = vst [vmem:[%s23_s1] sm:$0xff] %v4_v0 }

// kernel: tile.19
= control target key start
LH: loop header
LB: loop body
LE: loop exit
PB: predicated region body
PF: predicated region fallthrough
CT: control target
= control target key end

     0   :  { %s69_s10 = smov 112   ;;  %s70_s11 = smov 80   ;;  %vm3_vm0 = vcmask 130048   ;;  %vm9_vm1 = vcmask 1048448   ;;  %vm15_vm2 = vcmask 917248   ;;  %vm21_vm3 = vcmask 786048   ;;  %s113_s0 = inlined_call_operand.vmem [shape: f32[8,16], index: 0, kind: input, shape index: {}]   ;;  %s114_s1 = inlined_call_operand.vmem [shape: f32[1,128], index: 1, kind: output, shape index: {}]  }
   0x1   :  { %v55_v0 = vld [vmem:[%s113_s0 + $0x7] sm:$0x1]   ;;  %v57_v1 = vld [vmem:[%s113_s0 + $0x5] sm:$0x1]   ;;  %v56_v2 = vld [vmem:[%s113_s0 + $0x6] sm:$0x1]  }
   0x2   :  { %7 = vrot.lane.b32.xlu0 %v55_v0, %s69_s10  ;;  %19 = vrot.lane.b32.xlu1 %v57_v1, %s70_s11  ;;  %v58_v3 = vld [vmem:[%s113_s0 + $0x4] sm:$0x1]   ;;  %v2_v4 = vld [vmem:[%s113_s0] sm:$0x1]   ;;  %s71_s18 = smov 96   ;;  %s72_s19 = smov 64  }
   0x3   :  { %4 = vst.msk [vmem:[#allocation0] sm:$0x1] %vm3_vm0, %v2_v4   ;;  %v59_v5 = vld [vmem:[%s113_s0 + $0x3] sm:$0x1]   ;;  %v60_v6 = vld [vmem:[%s113_s0 + $0x2] sm:$0x1]  }
   0x4   :  { %s73_s24 = smov 48   ;;  %s74_s25 = smov 32   ;;  %v61_v7 = vld [vmem:[%s113_s0 + $0x1] sm:$0x1]   ;;  %vm27_vm4 = vcmask 654848   ;;  %vm33_vm5 = vcmask 523648  }
   0x5   :  { %s75_s0 = smov 16   ;;  %vm39_vm6 = vcmask 392448   ;;  %vm45_vm7 = vcmask 261248  }
   0x6   :  { %13 = vrot.lane.b32.xlu0 %v56_v2, %s71_s18  ;;  %25 = vrot.lane.b32.xlu1 %v58_v3, %s72_s19 }
   0xa   :  { %31 = vrot.lane.b32.xlu0 %v59_v5, %s73_s24  ;;  %37 = vrot.lane.b32.xlu1 %v60_v6, %s74_s25 }
   0xe   :  { %43 = vrot.lane.b32.xlu0 %v61_v7, %s75_s0 }
  0x74   :  { %v8_v8 = vpop.permute.xlu0 %7   ;;  %v20_v9 = vpop.permute.xlu1 %19  }
  0x75   :  { %10 = vst.msk [vmem:[#allocation0] sm:$0x1] %vm9_vm1, %v8_v8  }
  0x78   :  { %v14_v10 = vpop.permute.xlu0 %13   ;;  %v26_v11 = vpop.permute.xlu1 %25  }
  0x79   :  { %16 = vst.msk [vmem:[#allocation0] sm:$0x1] %vm15_vm2, %v14_v10  }
  0x7a   :  { %22 = vst.msk [vmem:[#allocation0] sm:$0x1] %vm21_vm3, %v20_v9  }
  0x7b   :  { %28 = vst.msk [vmem:[#allocation0] sm:$0x1] %vm27_vm4, %v26_v11  }
  0x7c   :  { %v32_v12 = vpop.permute.xlu0 %31   ;;  %v38_v13 = vpop.permute.xlu1 %37  }
  0x7d   :  { %34 = vst.msk [vmem:[#allocation0] sm:$0x1] %vm33_vm5, %v32_v12  }
  0x7e   :  { %40 = vst.msk [vmem:[#allocation0] sm:$0x1] %vm39_vm6, %v38_v13  }
  0x80   :  { %v44_v14 = vpop.permute.xlu0 %43  }
  0x81   :  { %46 = vst.msk [vmem:[#allocation0] sm:$0x1] %vm45_vm7, %v44_v14  }
  0x88   :  { %v51_v15 = vld [vmem:[#allocation0] sm:$0x1] }
  0x89   :  { %54 = vst [vmem:[%s114_s1] sm:$0x1] %v51_v15 }

// kernel: channel_se_layer_sa.1
= control target key start
LH: loop header
LB: loop body
LE: loop exit
PB: predicated region body
PF: predicated region fallthrough
CT: control target
= control target key end

     0   :  { %s576_s15 = smov 0   ;;  %s708_s0 = inlined_call_operand.vmem [shape: f32[16,128], index: 0, kind: input, shape index: {}]   ;;  %s709_s1 = inlined_call_operand.vmem [shape: f32[128,64], index: 1, kind: input, shape index: {}]   ;;  %s710_s2 = inlined_call_operand.vmem [shape: f32[64,128], index: 2, kind: input, shape index: {}]   ;;  %s711_s3 = inlined_call_operand.vmem [shape: f32[2,128], index: 3, kind: input, shape index: {}]   ;;  %s712_s4 = inlined_call_operand.vmem [shape: f32[16,128], index: 4, kind: output, shape index: {}]  }
   0x1 LB: > { %s434_s16 = sadd.s32 4294967295, %s547_s15   ;;  %p438_p0 = scmp.ge.s32.totalorder %s547_s15, 1  ;;  %s547_s15 = sphi %s576_s15, %s14_s15  }
   0x2   : > { %p161_p1 = scmp.lt.s32.totalorder %s547_s15, 3 }
   0x4   : > { %p162_p2 = pnand %p438_p0, %p161_p1 }
   0x5   : > { %p185_p3 = scmp.lt.s32.totalorder (!%p162_p2), %s434_s16, 1 }
   0x6   : > { %165 = sbr.rel (%p162_p2) target bundleno = 471 (0x1d7), region = 36 }
   0xb   : > { %v209_v0 = vld [vmem:[%s709_s1 + $0x78] sm:$0xff]  ;;  %v549_v1 = vmov 0.0   ;;  %v208_v2 = vld [vmem:[%s709_s1 + $0x70] sm:$0xff]  ;;  %vm550_vm0 = vmmov 0   ;;  %v207_v3 = vld [vmem:[%s709_s1 + $0x68] sm:$0xff]  ;;  %s714_s16 = smov (!%p185_p3, %s434_s16), 1 }
   0xc   : > { %473 = vmatprep.subr.mxu0 %v549_v1  ;;  %505 = vmatprep.mubr.msk.f32.mxu0 %vm550_vm0, %v549_v1  ;;  %v206_v4 = vld [vmem:[%s709_s1 + $0x60] sm:$0xff]  ;;  %v293_v5 = vld [vmem:[%s710_s2 + $0x38] sm:$0xff]  ;;  %v292_v6 = vld [vmem:[%s710_s2 + $0x30] sm:$0xff]  ;;  %s439_s29 = sshll.u32 %s714_s16, 3  ;;  %vm299_vm1 = vcmask 523264  }
   0xd   : > { %474 = vmatpush3.msra.mxu0 %v209_v0  ;;  %508 = vmatprep.subr.mxu1 %v549_v1  ;;  %v205_v7 = vld [vmem:[%s709_s1 + $0x58] sm:$0xff]  ;;  %v291_v8 = vld [vmem:[%s710_s2 + $0x28] sm:$0xff]  ;;  %v204_v9 = vld [vmem:[%s709_s1 + $0x50] sm:$0xff]  ;;  %s188_s10 = scalar_lea.vmem %s708_s0, %s439_s29  ;;  %s192_s27 = scalar_lea.vmem %s712_s4, %s439_s29 }
   0xe   : > { %475 = vmatprep.subr.mxu0 %v549_v1  ;;  %524 = vmatprep.mubr.msk.f32.mxu1 %vm550_vm0, %v549_v1  ;;  %v290_v10 = vld [vmem:[%s710_s2 + $0x20] sm:$0xff]  ;;  %v203_v11 = vld [vmem:[%s709_s1 + $0x48] sm:$0xff]  ;;  %v289_v12 = vld [vmem:[%s710_s2 + $0x18] sm:$0xff] }
   0xf   : > { %476 = vmatpush3.msra.mxu0 %v208_v2  ;;  %509 = vmatpush3.msra.mxu1 %v293_v5  ;;  %v202_v13 = vld [vmem:[%s709_s1 + $0x40] sm:$0xff]  ;;  %v201_v14 = vld [vmem:[%s709_s1 + $0x38] sm:$0xff]  ;;  %v200_v15 = vld [vmem:[%s709_s1 + $0x30] sm:$0xff] }
  0x10   : > { %477 = vmatprep.subr.mxu0 %v549_v1  ;;  %510 = vmatprep.subr.mxu1 %v549_v1  ;;  %v199_v16 = vld [vmem:[%s709_s1 + $0x28] sm:$0xff]  ;;  %v198_v17 = vld [vmem:[%s709_s1 + $0x20] sm:$0xff]  ;;  %v197_v18 = vld [vmem:[%s709_s1 + $0x18] sm:$0xff] }
  0x11   : > { %478 = vmatpush3.msra.mxu0 %v207_v3  ;;  %511 = vmatpush3.msra.mxu1 %v292_v6  ;;  %v196_v19 = vld [vmem:[%s709_s1 + $0x10] sm:$0xff]  ;;  %v195_v20 = vld [vmem:[%s709_s1 + $0x8] sm:$0xff]  ;;  %v194_v21 = vld [vmem:[%s709_s1] sm:$0xff] }
  0x12   : > { %479 = vmatprep.subr.mxu0 %v549_v1  ;;  %512 = vmatprep.subr.mxu1 %v549_v1  ;;  %v193_v22 = vld [vmem:[%s188_s10] sm:$0xff]  ;;  %v288_v23 = vld [vmem:[%s710_s2 + $0x10] sm:$0xff]  ;;  %v287_v24 = vld [vmem:[%s710_s2 + $0x8] sm:$0xff] }
  0x13   : > { %480 = vmatpush3.msra.mxu0 %v206_v4  ;;  %513 = vmatpush3.msra.mxu1 %v291_v8  ;;  %v286_v25 = vld [vmem:[%s710_s2] sm:$0xff] }
  0x14   : > { %481 = vmatprep.subr.mxu0 %v549_v1  ;;  %514 = vmatprep.subr.mxu1 %v549_v1  ;;  %v441_v26 = vld [vmem:[%s711_s3] ss:$0 sm:$0xff]  ;;  %v442_v31 = vld [vmem:[%s711_s3 + $0x1] ss:$0 sm:$0xff] }
  0x15   : > { %482 = vmatpush3.msra.mxu0 %v205_v7  ;;  %515 = vmatpush3.msra.mxu1 %v290_v10 }
  0x16   : > { %483 = vmatprep.subr.mxu0 %v549_v1  ;;  %516 = vmatprep.subr.mxu1 %v549_v1 }
  0x17   : > { %484 = vmatpush3.msra.mxu0 %v204_v9  ;;  %517 = vmatpush3.msra.mxu1 %v289_v12 }
  0x18   : > { %485 = vmatprep.subr.mxu0 %v549_v1  ;;  %518 = vmatprep.subr.mxu1 %v549_v1 }
  0x19   : > { %486 = vmatpush3.msra.mxu0 %v203_v11  ;;  %519 = vmatpush3.msra.mxu1 %v288_v23 }
  0x1a   : > { %487 = vmatprep.subr.mxu0 %v549_v1  ;;  %520 = vmatprep.subr.mxu1 %v549_v1 }
  0x1b   : > { %488 = vmatpush3.msra.mxu0 %v202_v13  ;;  %521 = vmatpush3.msra.mxu1 %v287_v24 }
  0x1c   : > { %489 = vmatprep.subr.mxu0 %v549_v1  ;;  %522 = vmatprep.subr.mxu1 %v549_v1 }
  0x1d   : > { %490 = vmatpush3.msra.mxu0 %v201_v14  ;;  %523 = vmatpush3.msra.mxu1 %v286_v25 }
  0x1e   : > { %491 = vmatprep.subr.mxu0 %v549_v1 }
  0x1f   : > { %492 = vmatpush3.msra.mxu0 %v200_v15 }
  0x20   : > { %493 = vmatprep.subr.mxu0 %v549_v1 }
  0x21   : > { %494 = vmatpush3.msra.mxu0 %v199_v16 }
  0x22   : > { %495 = vmatprep.subr.mxu0 %v549_v1 }
  0x23   : > { %496 = vmatpush3.msra.mxu0 %v198_v17 }
  0x24   : > { %497 = vmatprep.subr.mxu0 %v549_v1 }
  0x25   : > { %498 = vmatpush3.msra.mxu0 %v197_v18 }
  0x26   : > { %499 = vmatprep.subr.mxu0 %v549_v1 }
  0x27   : > { %500 = vmatpush3.msra.mxu0 %v196_v19 }
  0x28   : > { %501 = vmatprep.subr.mxu0 %v549_v1 }
  0x29   : > { %502 = vmatpush3.msra.mxu0 %v195_v20 }
  0x2a   : > { %503 = vmatprep.subr.mxu0 %v549_v1 }
  0x2b   : > { %504 = vmatpush3.msra.mxu0 %v194_v21 }
  0x2c   : > { %506 = vmatmul.mubr.f32.vlgmr.msra.gmra.mxu0 %v193_v22 }
  0xec   : > { %v281_v27 = vpop.f32.mrf.mxu0 }
  0xed   : > { %v282_v28 = vadd.f32 %v441_v26, %v281_v27 }
  0xee   : > { %v507_v29 = vpop.f32.mrf.mxu0 }
  0xef   : > { %v285_v30 = vmax.f32 %v282_v28, 0.0 }
  0xf1   : > { %525 = vmatmul.mubr.msk.f32.vlgmr.msra.gmra.mxu1 %vm299_vm1, %v285_v30 }
 0x1b1   : > { %v369_v32 = vpop.f32.mrf.mxu1 }
 0x1b2   : > { %v370_v33 = vadd.f32 %v442_v31, %v369_v32 }
 0x1b3   : > { %v526_v34 = vpop.f32.mrf.mxu1 }
 0x1b4   : > { %v444_v35 = vmul.f32 -1.442695, %v370_v33 }
 0x1b6   : > { %537 = vpow2.f32 %v444_v35 }
 0x1c3   : > { %v538_v36 = vpop.eup %537 }
 0x1c4   : > { %v376_v37 = vadd.f32 1.0, %v538_v36 }
 0x1c6   : > { %539 = vrcp.f32 %v376_v37 }
 0x1d3   : > { %v540_v38 = vpop.eup %539 }
 0x1d4   : > { %v379_v39 = vmul.f32 %v540_v38, %v193_v22 }
 0x1d6   : > { %380 = vst [vmem:[%s192_s27] sm:$0xff] %v379_v39 }
 0x1d7 PF: > { %s14_s15 = sadd.s32 1, %s547_s15  }
 0x1d8   : > { %p11_p4 = scmp.ge.s32.totalorder %s14_s15, 4  }
 0x1da   :  { %13 = sbr.rel (!%p11_p4) target bundleno = 1 (0x1), region = 66 }

</bundles_post_ra>
